<compile_context>
chip_gen: v7x
topology: tpu7x:2x2x1
jax: 0.10.0
libtpu: 0.0.40
codegen_flags: <defaults>
</compile_context>

<pallas_src>
import jax
import jax.numpy as jnp
from jax.experimental import pallas as pl
from jax.experimental.pallas import tpu as pltpu


def bert_classifier_kernel(vl_ref, emb_ref, wp_ref, bp_ref, wc_ref, bc_ref,
                           out_ref, acc_ref):
    """Fused: mask gen -> masked sum (MXU, accumulated over seq tiles)
    -> mean -> tanh pooler -> lane-dense classifier.

    Grid = (batch_tiles, seq_tiles); seq is the reduction axis ("arbitrary").

    vl_ref : [TB, 1]      int32     valid lengths, pre-clamped to S
    emb_ref: [TB, TS, H]  bfloat16  token+segment embeddings (seq tile)
    wp_ref : [H, H]       bfloat16  pooler dense weight (grid-resident)
    bp_ref : [1, H]       float32   pooler dense bias
    wc_ref : [H, 128]     bfloat16  classifier weight, lane-padded
    bc_ref : [1, 128]     float32   classifier bias, lane-padded
    out_ref: [TB, 128]    float32   logits (lane-padded)
    acc_ref: [TB, H]      float32   scratch: masked-sum accumulator
    """
    s = pl.program_id(1)
    ns = pl.num_programs(1)
    TB, TS, _ = emb_ref.shape

    # --- init accumulator at the first seq tile of each batch tile ----------
    @pl.when(s == 0)
    def _():
        acc_ref[...] = jnp.zeros_like(acc_ref)

    # --- gen_attention_mask for this seq tile: mask[i, j] = (j < vl[i]) ------
    seq_idx = jax.lax.broadcasted_iota(jnp.int32, (TB, TS), 1) + s * TS
    mask = (seq_idx < vl_ref[...]).astype(jnp.bfloat16)                 # [TB, TS]

    # --- masked partial sums on the MXU (bf16 operands, f32 accumulation) ----
    # Batched [1,TS]@[TS,H] per batch row: avoids an f32 [TB,TS,H] temporary
    # and keeps the VALU/XLU slots free on the per-step critical path.
    psum = jnp.einsum("bqs,bsh->bqh", mask[:, None, :], emb_ref[...],
                      preferred_element_type=jnp.float32)               # [TB,1,H]
    acc_ref[...] += psum[:, 0, :]

    # --- finalize once per batch tile: mean -> pooler dense + tanh -> head ---
    @pl.when(s == ns - 1)
    def _():
        # Analytic mask count: min(valid_length, S) (clamped in wrapper), >= 1.
        denom = jnp.maximum(vl_ref[...].astype(jnp.float32), 1.0)        # [TB, 1]
        pooled = (acc_ref[...] / denom).astype(jnp.bfloat16)             # [TB, H]
        pooler = jnp.tanh(
            jnp.dot(pooled, wp_ref[...], preferred_element_type=jnp.float32)
            + bp_ref[...]
        )                                                                # [TB, H]
        # TODO(synk): dropout (dr_rate) would use pltpu.prng_seed +
        # pltpu.stateful_bernoulli; dr_rate=None (eval mode) -> identity.
        out_ref[...] = (
            jnp.dot(pooler.astype(jnp.bfloat16), wc_ref[...],
                    preferred_element_type=jnp.float32)
            + bc_ref[...]
        )                                                                # [TB, 128]


def _round_up(x, m):
    return ((x + m - 1) // m) * m


def _vmem_budget_bytes():
    """Per-generation VMEM budget (bytes) and physical capacity (or None)."""
    try:
        phys = int(pltpu.get_tpu_info().vmem_capacity_bytes)
    except Exception:
        # Unknown chip: assume the smallest (v7x, 64 MiB) so the plan fits
        # everywhere.
        return 48 * 1024 * 1024, None
    return min(phys * 3 // 4, 96 * 1024 * 1024), phys


def _pick_tiles(B, S, H, c_pad, tb, ts, vmem_budget):
    """Pick (tb, ts) so double-buffered bf16 emb stream + resident weights fit."""
    if tb is None:
        tb = 128
    tb = max(8, _round_up(min(tb, _round_up(B, 8)), 8))
    if ts is None:
        ts = 512
    ts = max(16, _round_up(min(ts, _round_up(S, 16)), 16))

    def footprint(tb_, ts_):
        weights = 2 * (H * H * 2 + H * c_pad * 2)        # bf16 wp/wc (dbl-buffered)
        biases = 2 * (H * 4 + c_pad * 4)
        per_bt = tb_ * H * 4 + 2 * tb_ * c_pad * 4 + 2 * tb_ * 4
        emb = 2 * tb_ * ts_ * H * 2                       # bf16 stream, dbl-buffered
        return weights + biases + per_bt + emb

    while ts > 16 and footprint(tb, ts) > vmem_budget:
        ts -= 16
    while tb > 8 and footprint(tb, ts) > vmem_budget:
        tb -= 8
    return tb, ts


def bert_classifier_forward(token_ids, valid_length, segment_ids, params,
                            *, tb=None, ts=None):
    """Wrapper: embedding gather in XLA (glue), fused hot path in Pallas.

    tb/ts default to generation-sized tiles (VMEM-budget aware); pass
    explicit small values to exercise the multi-tile reduction path.
    """
    B, S = token_ids.shape
    H = params["word_emb"].shape[1]
    C = params["wc"].shape[1]
    C_PAD = 128  # lane-dense classifier output

    tb_was_auto = tb is None
    budget, phys = _vmem_budget_bytes()
    tb, ts = _pick_tiles(B, S, H, C_PAD, tb, ts, budget)

    # v7x (64 MiB VMEM, 2 TensorCores): keep >= 2 batch tiles so the
    # "parallel" batch axis shards across both cores.  No-op on v5e/v6e.
    if tb_was_auto and phys is not None and phys <= 64 * 1024 * 1024:
        b_hint = _round_up(B, 8)
        if b_hint >= 16 and b_hint // tb < 2:
            tb = max(8, _round_up(b_hint // 2, 8))

    b_pad = _round_up(B, tb)
    s_pad = _round_up(S, ts)
    nb, ns = b_pad // tb, s_pad // ts

    # Embedding gather is glue (data-dependent row gather; done in XLA).
    # TODO(synk): fuse the gather in-kernel (scalar-prefetched token ids +
    # manual DMA row gather from HBM word_emb) to remove the [B,S,H] intermediate.
    emb = (params["word_emb"][token_ids]
           + params["seg_emb"][segment_ids]).astype(jnp.bfloat16)        # [B, S, H]

    # Pad batch / seq up to tile multiples (padded rows get valid_length=0,
    # padded seq positions are masked out by the in-kernel attention mask).
    if b_pad != B or s_pad != S:
        emb = jnp.pad(emb, ((0, b_pad - B), (0, s_pad - S), (0, 0)))
    vl = jnp.minimum(valid_length.astype(jnp.int32), S)   # denom = min(vl, S)
    vl = jnp.pad(vl, (0, b_pad - B)).reshape(b_pad, 1)

    # bf16 weights (halve resident VMEM, double MXU throughput; f32 acc).
    wp = params["wp"].astype(jnp.bfloat16)
    bp = params["bp"].reshape(1, H).astype(jnp.float32)
    wc_pad = jnp.zeros((H, C_PAD), jnp.bfloat16).at[:, :C].set(
        params["wc"].astype(jnp.bfloat16))
    bc_pad = jnp.zeros((1, C_PAD), jnp.float32).at[:, :C].set(
        params["bc"].reshape(1, C).astype(jnp.float32))

    cost = pl.CostEstimate(
        flops=2 * b_pad * s_pad * H + 2 * b_pad * H * H + 2 * b_pad * H * C_PAD,
        transcendentals=b_pad * H,
        bytes_accessed=(b_pad * s_pad * H * 2                 # bf16 emb stream
                        + (H * H + H * C_PAD) * 2             # bf16 weights
                        + (H + C_PAD) * 4                     # biases
                        + b_pad * (4 + C_PAD * 4)),           # vl + logits
    )

    out = pl.pallas_call(
        bert_classifier_kernel,
        out_shape=jax.ShapeDtypeStruct((b_pad, C_PAD), jnp.float32),
        grid_spec=pltpu.PrefetchScalarGridSpec(
            num_scalar_prefetch=0,
            grid=(nb, ns),
            in_specs=[
                pl.BlockSpec((tb, 1), lambda b, s: (b, 0)),         # valid_length
                pl.BlockSpec((tb, ts, H), lambda b, s: (b, s, 0)),  # emb (streamed)
                pl.BlockSpec((H, H), lambda b, s: (0, 0)),          # wp (resident)
                pl.BlockSpec((1, H), lambda b, s: (0, 0)),          # bp (resident)
                pl.BlockSpec((H, C_PAD), lambda b, s: (0, 0)),      # wc (resident)
                pl.BlockSpec((1, C_PAD), lambda b, s: (0, 0)),      # bc (resident)
            ],
            out_specs=pl.BlockSpec((tb, C_PAD), lambda b, s: (b, 0)),
            scratch_shapes=[
                pltpu.VMEM((tb, H), jnp.float32),   # masked-sum accumulator
            ],
        ),
        compiler_params=pltpu.CompilerParams(
            # batch tiles split across TensorCores (v7x megacore); seq is the
            # accumulation axis.
            dimension_semantics=("parallel", "arbitrary"),
            vmem_limit_bytes=budget,
        ),
        cost_estimate=cost,
    )(vl, emb, wp, bp, wc_pad, bc_pad)

    return out[:B, :C]


def reference_forward(token_ids, valid_length, segment_ids, params):
    """Pure-JAX reference mirroring the kernel's precision path."""
    B, S = token_ids.shape
    H = params["word_emb"].shape[1]
    emb = (params["word_emb"][token_ids]
           + params["seg_emb"][segment_ids]).astype(jnp.bfloat16)
    vl = jnp.minimum(valid_length.astype(jnp.int32), S)
    mask = (jnp.arange(S)[None, :] < vl[:, None]).astype(jnp.bfloat16)
    summed = jnp.einsum("bs,bsh->bh", mask, emb,
                        preferred_element_type=jnp.float32)
    denom = jnp.maximum(vl.astype(jnp.float32), 1.0)[:, None]
    pooled = (summed / denom).astype(jnp.bfloat16)
    pooler = jnp.tanh(
        jnp.dot(pooled, params["wp"].astype(jnp.bfloat16),
                preferred_element_type=jnp.float32)
        + params["bp"].reshape(1, H).astype(jnp.float32))
    return (jnp.dot(pooler.astype(jnp.bfloat16),
                    params["wc"].astype(jnp.bfloat16),
                    preferred_element_type=jnp.float32)
            + params["bc"].reshape(1, -1).astype(jnp.float32))


if __name__ == "__main__":
    # Small shapes that still exercise the (batch, seq) grid + padding.
    B, S, H, C, V = 12, 40, 32, 4, 64   # batch, seq, hidden, num_classes, vocab

    key = jax.random.PRNGKey(0)
    k_we, k_se, k_wp, k_bp, k_wc, k_bc, k_tok, k_seg, k_vl = jax.random.split(key, 9)

    params = {
        "word_emb": 0.5 * jax.random.normal(k_we, (V, H), jnp.float32),
        "seg_emb":  0.5 * jax.random.normal(k_se, (2, H), jnp.float32),
        "wp":       0.2 * jax.random.normal(k_wp, (H, H), jnp.float32),
        "bp":       0.1 * jax.random.normal(k_bp, (1, H), jnp.float32),
        "wc":       0.2 * jax.random.normal(k_wc, (H, C), jnp.float32),
        "bc":       0.1 * jax.random.normal(k_bc, (1, C), jnp.float32),
    }

    token_ids = jax.random.randint(k_tok, (B, S), 0, V, dtype=jnp.int32)
    segment_ids = jax.random.randint(k_seg, (B, S), 0, 2, dtype=jnp.int32)
    valid_length = jax.random.randint(k_vl, (B,), 1, S + 1, dtype=jnp.int32)

    ref = reference_forward(token_ids, valid_length, segment_ids, params)

    # 1) Explicit small tiles: exercises multi-tile seq reduction + padding
    #    (batch tiles = 2 with 12 -> 16, seq tiles = 3 with 40 -> 48).
    logits_small = bert_classifier_forward(token_ids, valid_length, segment_ids,
                                           params, tb=8, ts=16)
    logits_small = jax.block_until_ready(logits_small)
    assert logits_small.shape == (B, C)
    assert jnp.allclose(logits_small, ref, atol=2e-3, rtol=2e-2), (logits_small, ref)

    # 2) Auto (generation-aware) tiles: full-seq single-step path.
    logits_auto = jax.block_until_ready(
        bert_classifier_forward(token_ids, valid_length, segment_ids, params))
    assert logits_auto.shape == (B, C)
    assert jnp.allclose(logits_auto, ref, atol=2e-3, rtol=2e-2), (logits_auto, ref)

    print("KERNEL_OK")
</pallas_src>

<mosaic_0001>
module attributes {stable_mosaic.version = 11 : i64} {
  func.func @bert_classifier_kernel(%arg0: i32, %arg1: i32, %arg2: memref<8x1xi32, #tpu.memory_space<vmem>>, %arg3: memref<8x16x32xbf16, #tpu.memory_space<vmem>>, %arg4: memref<32x32xbf16, #tpu.memory_space<vmem>>, %arg5: memref<1x32xf32, #tpu.memory_space<vmem>>, %arg6: memref<32x128xbf16, #tpu.memory_space<vmem>>, %arg7: memref<1x128xf32, #tpu.memory_space<vmem>>, %arg8: memref<8x128xf32, #tpu.memory_space<vmem>>, %arg9: memref<8x32xf32, #tpu.memory_space<vmem>>) attributes {dimension_semantics = [#tpu.dimension_semantics<parallel>, #tpu.dimension_semantics<arbitrary>], iteration_bounds = array<i64: 2, 3>, scalar_prefetch = 0 : i64, scratch_operands = 1 : i64, tpu.core_type = #tpu.core_type<tc>, window_params = [{transform_indices = @transform_0, window_bounds = array<i64: 8, 1>}, {transform_indices = @transform_1, window_bounds = array<i64: 8, 16, 32>}, {pipeline_mode = #tpu.pipeline_mode<synchronous>, transform_indices = @transform_2, window_bounds = array<i64: 32, 32>}, {pipeline_mode = #tpu.pipeline_mode<synchronous>, transform_indices = @transform_3, window_bounds = array<i64: 1, 32>}, {pipeline_mode = #tpu.pipeline_mode<synchronous>, transform_indices = @transform_4, window_bounds = array<i64: 32, 128>}, {pipeline_mode = #tpu.pipeline_mode<synchronous>, transform_indices = @transform_5, window_bounds = array<i64: 1, 128>}, {transform_indices = @transform_6, window_bounds = array<i64: 8, 128>}]} {
    %c0_i32 = arith.constant 0 : i32
    %0 = arith.cmpi eq, %arg1, %c0_i32 : i32
    %1 = arith.extui %0 : i1 to i32
    %c0_i32_0 = arith.constant 0 : i32
    %2 = arith.cmpi ne, %1, %c0_i32_0 : i32
    scf.if %2 {
      %cst_10 = arith.constant 0.000000e+00 : f32
      %23 = vector.broadcast %cst_10 : f32 to vector<8x32xf32>
      %c0_11 = arith.constant 0 : index
      %c0_12 = arith.constant 0 : index
      %24 = vector.load %arg9[%c0_11, %c0_12] : memref<8x32xf32, #tpu.memory_space<vmem>>, vector<8x32xf32>
      tpu.vector_store %arg9[%c0_11, %c0_12], %23 {strides = array<i32>} : memref<8x32xf32, #tpu.memory_space<vmem>>, vector<8x32xf32>,
    } else {
    }
    %3 = tpu.iota {dimensions = array<i32: 1>} : vector<8x16xi32>
    %c16_i32 = arith.constant 16 : i32
    %4 = arith.muli %arg1, %c16_i32 : i32
    %5 = vector.broadcast %4 : i32 to vector<8x16xi32>
    %6 = arith.addi %3, %5 : vector<8x16xi32>
    %c0 = arith.constant 0 : index
    %c0_1 = arith.constant 0 : index
    %7 = vector.load %arg2[%c0, %c0_1] : memref<8x1xi32, #tpu.memory_space<vmem>>, vector<8x1xi32>
    %8 = vector.broadcast %7 : vector<8x1xi32> to vector<8x16xi32>
    %9 = arith.cmpi slt, %6, %8 : vector<8x16xi32>
    %10 = arith.extui %9 : vector<8x16xi1> to vector<8x16xi32>
    %11 = arith.sitofp %10 : vector<8x16xi32> to vector<8x16xf32>
    %12 = arith.truncf %11 : vector<8x16xf32> to vector<8x16xbf16>
    %13 = vector.shape_cast %12 : vector<8x16xbf16> to vector<8x1x16xbf16>
    %c0_2 = arith.constant 0 : index
    %c0_3 = arith.constant 0 : index
    %c0_4 = arith.constant 0 : index
    %14 = vector.load %arg3[%c0_2, %c0_3, %c0_4] : memref<8x16x32xbf16, #tpu.memory_space<vmem>>, vector<8x16x32xbf16>
    "tpu.trace_start"() <{level = 10 : i32, message = "bqs,bsh->bqh"}> : () -> ()
    %cst = arith.constant dense<0.000000e+00> : vector<8x1x32xf32>
    %15 = tpu.matmul %13, %14, %cst {dimension_numbers = #tpu.dot_dimension_numbers<[2], [1], [1], [2], [0, 0, 0, 1, 1, 2], [0], [0]>} : vector<8x1x16xbf16>, vector<8x16x32xbf16>, vector<8x1x32xf32> -> vector<8x1x32xf32>
    "tpu.trace_stop"() : () -> ()
    %c0_5 = arith.constant 0 : index
    %c0_6 = arith.constant 0 : index
    %16 = vector.load %arg9[%c0_5, %c0_6] : memref<8x32xf32, #tpu.memory_space<vmem>>, vector<8x32xf32>
    %17 = vector.shape_cast %15 : vector<8x1x32xf32> to vector<8x32xf32>
    %18 = arith.addf %16, %17 : vector<8x32xf32>
    %c0_7 = arith.constant 0 : index
    %c0_8 = arith.constant 0 : index
    %19 = vector.load %arg9[%c0_7, %c0_8] : memref<8x32xf32, #tpu.memory_space<vmem>>, vector<8x32xf32>
    tpu.vector_store %arg9[%c0_7, %c0_8], %18 {strides = array<i32>} : memref<8x32xf32, #tpu.memory_space<vmem>>, vector<8x32xf32>,
    %c2_i32 = arith.constant 2 : i32
    %20 = arith.cmpi eq, %arg1, %c2_i32 : i32
    %21 = arith.extui %20 : i1 to i32
    %c0_i32_9 = arith.constant 0 : i32
    %22 = arith.cmpi ne, %21, %c0_i32_9 : i32
    scf.if %22 {
      %c0_10 = arith.constant 0 : index
      %c0_11 = arith.constant 0 : index
      %23 = vector.load %arg2[%c0_10, %c0_11] : memref<8x1xi32, #tpu.memory_space<vmem>>, vector<8x1xi32>
      %24 = arith.sitofp %23 : vector<8x1xi32> to vector<8x1xf32>
      %cst_12 = arith.constant 1.000000e+00 : f32
      %25 = vector.broadcast %cst_12 : f32 to vector<8x1xf32>
      %26 = arith.maximumf %24, %25 : vector<8x1xf32>
      %c0_13 = arith.constant 0 : index
      %c0_14 = arith.constant 0 : index
      %27 = vector.load %arg9[%c0_13, %c0_14] : memref<8x32xf32, #tpu.memory_space<vmem>>, vector<8x32xf32>
      %28 = vector.broadcast %26 : vector<8x1xf32> to vector<8x32xf32>
      %29 = arith.divf %27, %28 : vector<8x32xf32>
      %30 = arith.truncf %29 : vector<8x32xf32> to vector<8x32xbf16>
      %c0_15 = arith.constant 0 : index
      %c0_16 = arith.constant 0 : index
      %31 = vector.load %arg4[%c0_15, %c0_16] : memref<32x32xbf16, #tpu.memory_space<vmem>>, vector<32x32xbf16>
      %cst_17 = arith.constant dense<0.000000e+00> : vector<8x32xf32>
      %32 = tpu.matmul %30, %31, %cst_17 {dimension_numbers = #tpu.dot_dimension_numbers<[1], [0], [0], [1], [0, 0, 1, 1], [], []>} : vector<8x32xbf16>, vector<32x32xbf16>, vector<8x32xf32> -> vector<8x32xf32>
      %c0_18 = arith.constant 0 : index
      %c0_19 = arith.constant 0 : index
      %33 = vector.load %arg5[%c0_18, %c0_19] : memref<1x32xf32, #tpu.memory_space<vmem>>, vector<1x32xf32>
      %34 = vector.broadcast %33 : vector<1x32xf32> to vector<8x32xf32>
      %35 = arith.addf %32, %34 : vector<8x32xf32>
      %36 = math.tanh %35 : vector<8x32xf32>
      %37 = arith.truncf %36 : vector<8x32xf32> to vector<8x32xbf16>
      %c0_20 = arith.constant 0 : index
      %c0_21 = arith.constant 0 : index
      %38 = vector.load %arg6[%c0_20, %c0_21] : memref<32x128xbf16, #tpu.memory_space<vmem>>, vector<32x128xbf16>
      %cst_22 = arith.constant dense<0.000000e+00> : vector<8x128xf32>
      %39 = tpu.matmul %37, %38, %cst_22 {dimension_numbers = #tpu.dot_dimension_numbers<[1], [0], [0], [1], [0, 0, 1, 1], [], []>} : vector<8x32xbf16>, vector<32x128xbf16>, vector<8x128xf32> -> vector<8x128xf32>
      %c0_23 = arith.constant 0 : index
      %c0_24 = arith.constant 0 : index
      %40 = vector.load %arg7[%c0_23, %c0_24] : memref<1x128xf32, #tpu.memory_space<vmem>>, vector<1x128xf32>
      %41 = vector.broadcast %40 : vector<1x128xf32> to vector<8x128xf32>
      %42 = arith.addf %39, %41 : vector<8x128xf32>
      %c0_25 = arith.constant 0 : index
      %c0_26 = arith.constant 0 : index
      %43 = vector.load %arg8[%c0_25, %c0_26] : memref<8x128xf32, #tpu.memory_space<vmem>>, vector<8x128xf32>
      tpu.vector_store %arg8[%c0_25, %c0_26], %42 {strides = array<i32>} : memref<8x128xf32, #tpu.memory_space<vmem>>, vector<8x128xf32>,
    } else {
    }
    return
  }
  func.func @transform_0(%arg0: i32, %arg1: i32) -> (i32, i32) {
    %c0_i32 = arith.constant 0 : i32
    %c0_i32_0 = arith.constant 0 : i32
    return %arg0, %c0_i32 : i32, i32
  }
  func.func @transform_1(%arg0: i32, %arg1: i32) -> (i32, i32, i32) {
    %c0_i32 = arith.constant 0 : i32
    %c0_i32_0 = arith.constant 0 : i32
    return %arg0, %arg1, %c0_i32 : i32, i32, i32
  }
  func.func @transform_2(%arg0: i32, %arg1: i32) -> (i32, i32) {
    %c0_i32 = arith.constant 0 : i32
    %c0_i32_0 = arith.constant 0 : i32
    %c0_i32_1 = arith.constant 0 : i32
    return %c0_i32, %c0_i32_0 : i32, i32
  }
  func.func @transform_3(%arg0: i32, %arg1: i32) -> (i32, i32) {
    %c0_i32 = arith.constant 0 : i32
    %c0_i32_0 = arith.constant 0 : i32
    %c0_i32_1 = arith.constant 0 : i32
    return %c0_i32, %c0_i32_0 : i32, i32
  }
  func.func @transform_4(%arg0: i32, %arg1: i32) -> (i32, i32) {
    %c0_i32 = arith.constant 0 : i32
    %c0_i32_0 = arith.constant 0 : i32
    %c0_i32_1 = arith.constant 0 : i32
    return %c0_i32, %c0_i32_0 : i32, i32
  }
  func.func @transform_5(%arg0: i32, %arg1: i32) -> (i32, i32) {
    %c0_i32 = arith.constant 0 : i32
    %c0_i32_0 = arith.constant 0 : i32
    %c0_i32_1 = arith.constant 0 : i32
    return %c0_i32, %c0_i32_0 : i32, i32
  }
  func.func @transform_6(%arg0: i32, %arg1: i32) -> (i32, i32) {
    %c0_i32 = arith.constant 0 : i32
    %c0_i32_0 = arith.constant 0 : i32
    return %arg0, %c0_i32 : i32, i32
  }
}

</mosaic_0001>

<bundles_post_ra>
// kernel: tpu_custom_call.1
= control target key start
LH: loop header
LB: loop body
LE: loop exit
PB: predicated region body
PF: predicated region fallthrough
CT: control target
= control target key end

     0   :  { %11 = vsyncpa [#allocation5], 0  ;;  %s1832_s0 = inlined_call_operand.vmem [shape: s32[16,1], index: 0, kind: input, shape index: {}]   ;;  %s1833_s1 = inlined_call_operand.vmem [shape: bf16[16,48,32], index: 1, kind: input, shape index: {}]   ;;  %s1834_s2 = inlined_call_operand.vmem [shape: bf16[32,32], index: 2, kind: input, shape index: {}]   ;;  %s1835_s3 = inlined_call_operand.vmem [shape: f32[1,32], index: 3, kind: input, shape index: {}]   ;;  %s1836_s4 = inlined_call_operand.vmem [shape: bf16[32,128], index: 4, kind: input, shape index: {}]   ;;  %s1837_s5 = inlined_call_operand.vmem [shape: f32[1,128], index: 5, kind: input, shape index: {}]   ;;  %s1838_s6 = inlined_call_operand.hbm [shape: f32[16,128], index: 6, kind: output, shape index: {}]  }
   0x1   :  { %13 = vsyncpa [#allocation5 + $0x1], 0  ;;  %s1585_s21 = smov 0   ;;  %s1587_s22 = smov 0  }
   0x2   :  { %s1589_s23 = smov 0   ;;  %s1591_s24 = smov 0  }
   0x3   :  { %s1593_s25 = smov 0   ;;  %s1595_s26 = smov 0  }
   0x4   :  { %s1597_s27 = smov 0   ;;  %s1599_s28 = smov 0  }
   0x5   :  { %s1601_s29 = smov 0   ;;  %s1603_s30 = smov 0  }
   0x6 LB: > { %s1180_s7 = sadd.s32 4294967295, %s1539_s30   ;;  %s1181_s8 = sadd.s32 4294967294, %s1539_s30   ;;  %s1539_s30 = sphi %s1603_s30, %s19_s30   ;;  %s1535_s29 = sphi %s1601_s29, %s1858_s29   ;;  %s1531_s28 = sphi %s1599_s28, %s1857_s28   ;;  %s1527_s27 = sphi %s1597_s27, %s1856_s27   ;;  %s1523_s26 = sphi %s1595_s26, %s1855_s26   ;;  %s1519_s25 = sphi %s1593_s25, %s1854_s25   ;;  %s1515_s24 = sphi %s1591_s24, %s1853_s24   ;;  %s1511_s23 = sphi %s1589_s23, %s1852_s23   ;;  %s1507_s22 = sphi %s1587_s22, %s1851_s22   ;;  %s1503_s21 = sphi %s1585_s21, %s1850_s21  }
   0x7   : > { %s28_s9 = sadd.s32 1, %s1531_s28  ;;  %s31_s10 = sadd.s32 1, %s1535_s29 }
   0x8   : > { %p29_p0 = scmp.ge.s32.totalorder %s28_s9, 3  ;;  %s66_s11 = sadd.s32 1, %s1519_s25 }
   0x9   : > { %p73_p1 = scmp.ne.s32.totalorder %s1519_s25, %s1515_s24  ;;  %p74_p2 = scmp.eq.s32.totalorder %s1539_s30, 0 }
   0xa   : > { %s1860_s9 = smov (%p29_p0, %s28_s9), 0  ;;  %s1862_s10 = smov (!%p29_p0, %s31_s10), %s1535_s29 }
   0xb   : > { %1841 = sst [smem:[#allocation7_spill]] %s1860_s9  ;;  %s62_s12 = ssub.s32 %s1531_s28, %s1860_s9 }
   0xc   : > { %p1648_p3 = por %p74_p2, %p73_p1  ;;  %p33_p4 = scmp.ge.s32.totalorder %s1862_s10, 2 }
   0xd   : > { %s176_s14 = sadd.s32 1, %s1511_s23  ;;  %p186_p5 = scmp.ne.s32.totalorder %s1511_s23, %s1507_s22 }
   0xe   : > { %p187_p6 = scmp.eq.s32.totalorder %s1180_s7, 5  ;;  %s1864_s10 = smov (%p33_p4, %s1862_s10), 0 }
   0xf   : > { %1843 = sst [smem:[#allocation8_spill]] %s1864_s10  ;;  %p192_p8 = scmp.ne.s32.totalorder %s1507_s22, %s1503_s21 }
  0x10   : > { %p1657_p7 = por %p187_p6, %p186_p5  ;;  %s61_s16 = ssub.s32 %s1535_s29, %s1864_s10 }
  0x11   : > { %p193_p9 = scmp.eq.s32.totalorder %s1181_s8, 5  ;;  %s63_s17 = sor.u32 %s62_s12, %s61_s16 }
  0x12   : > { %p174_p10 = scmp.eq.s32.totalorder %s61_s16, 0  ;;  %p64_p11 = scmp.eq.s32.totalorder %s63_s17, 0 }
  0x13   : > { %p1665_p12 = por %p193_p9, %p192_p8  ;;  %p1183_p13 = scmp.ge.s32.totalorder %s1539_s30, 6 }
  0x14   : > { %s1670_s19 = scalar_select %p174_p10, %s1511_s23, %s176_s14  }
  0x15   : > { %s1673_s20 = scalar_select %p64_p11, %s1519_s25, %s66_s11  }
  0x16   : > { %221 = sbr.rel (%p1183_p13) target bundleno = 41 (0x29), region = 32 }
  0x17   : > { %1846 = sst [smem:[#allocation9_spill]] %s1673_s20 }
  0x1d   : > { %231 = sbr.rel (!%p1648_p3) target bundleno = 41 (0x29), region = 40  ;;  %s233_s7 = sand.u32 (%p1648_p3), 1, %s1519_s25  }
  0x1e   : > { %s1186_s8 = sshll.u32 (%p1648_p3), %s1531_s28, 1  ;;  %s1184_s12 = sshll.u32 (%p1648_p3), %s233_s7, 6 }
  0x1f   : > { %s1315_s16 = smul.u32 (%p1648_p3), 48, %s1535_s29  ;;  %s235_s20 = scalar_lea.vmem (%p1648_p3), [#allocation3], %s1184_s12 }
  0x21   : > { %s239_s17 = sadd.s32 (%p1648_p3), %s1315_s16, %s1186_s8 }
  0x22   : > { %s1188_s10 = sshll.u32 (%p1648_p3), %s239_s17, 2 }
  0x23   : > { %s241_s11 = scalar_lea.vmem (%p1648_p3), %s1833_s1, %s1188_s10 }
  0x24   : > { %v257_v0 = vld [vmem:[%s241_s11] sm:$0xff]   ;;  %v261_v1 = vld [vmem:[%s241_s11 + $0x18] sm:$0xff]   ;;  %v265_v2 = vld [vmem:[%s241_s11 + $0x30] sm:$0xff]  }
  0x25   : > { %258 = vst [vmem:[%s235_s20] sm:$0xff] %v257_v0   ;;  %262 = vst [vmem:[%s235_s20 + $0x8] sm:$0xff] %v261_v1   ;;  %v269_v3 = vld [vmem:[%s241_s11 + $0x48] sm:$0xff]   ;;  %v273_v4 = vld [vmem:[%s241_s11 + $0x60] sm:$0xff]  }
  0x26   : > { %266 = vst [vmem:[%s235_s20 + $0x10] sm:$0xff] %v265_v2   ;;  %v277_v5 = vld [vmem:[%s241_s11 + $0x78] sm:$0xff]   ;;  %270 = vst [vmem:[%s235_s20 + $0x18] sm:$0xff] %v269_v3   ;;  %v281_v6 = vld [vmem:[%s241_s11 + $0x90] sm:$0xff]  }
  0x27   : > { %274 = vst [vmem:[%s235_s20 + $0x20] sm:$0xff] %v273_v4   ;;  %278 = vst [vmem:[%s235_s20 + $0x28] sm:$0xff] %v277_v5   ;;  %v285_v7 = vld [vmem:[%s241_s11 + $0xa8] sm:$0xff]  }
  0x28   : > { %282 = vst [vmem:[%s235_s20 + $0x30] sm:$0xff] %v281_v6   ;;  %286 = vst [vmem:[%s235_s20 + $0x38] sm:$0xff] %v285_v7  }
  0x29 PF: > { %p1189_p0 = scmp.ge.s32.totalorder %s1539_s30, 1  ;;  %p342_p1 = scmp.lt.s32.totalorder %s1539_s30, 7 }
  0x2b   : > { %p343_p2 = pnand %p1189_p0, %p342_p1 }
  0x2c   : > { %s349_s9 = sand.u32 (!%p343_p2), 1, %s1515_s24   ;;  %s379_s10 = sand.u32 (!%p343_p2), 1, %s1507_s22  }
  0x2d   : > { %346 = sbr.rel (%p343_p2) target bundleno = 923 (0x39b), region = 81  ;;  %s1190_s13 = sshll.u32 (!%p343_p2), %s349_s9, 6 }
  0x2e   : > { %s1690_s7 = sshll.u32 (!%p343_p2), %s379_s10, 3  ;;  %p382_p3 = scmp.lt.s32.totalorder (!%p343_p2), %s1527_s27, 1 }
  0x2f   : > { %s1699_s14 = scalar_lea.vmem (!%p343_p2), [#allocation3], %s1190_s13  ;;  %s381_s11 = scalar_lea.vmem (!%p343_p2), [#allocation4], %s1690_s7 }
  0x30   : > { %p1193_p4 = scmp.ne.s32.totalorder (!%p343_p2), %s1523_s26, 0 }
  0x34   : > { %s383_s20 = scalar_select %p382_p3, %s1527_s27, 1 }
  0x35   : > { %392 = sbr.rel (%p1193_p4) target bundleno = 60 (0x3c), region = 89  ;;  %vm393_vm0 = vcmask (!%p1193_p4), 261120   ;;  %v1541_v8 = vmov (!%p1193_p4), 0.0  }
  0x36   : > { %s1192_s8 = sshll.u32 %s383_s20, 3  ;;  %394 = vst.msk [vmem:[#allocation2] sm:$0xff] (!%p1193_p4), %vm393_vm0, %v1541_v8 }
  0x37   : > { %s1697_s17 = scalar_lea.vmem %s1832_s0, %s1192_s8 }
  0x3c PF: > { %v400_v9 = vld [vmem:[%s1697_s17] sm:$0xff]  ;;  %v1542_v10 = vmov 0   ;;  %v1543_v11 = vmov 0.0   ;;  %v1412_v12 = vld [vmem:[%s1699_s14] sm:$0xff]   ;;  %vm1544_vm1 = vmmov 0   ;;  %v395_v14 = vlaneseq  ;;  %s1194_s24 = sshll.u32 %s1523_s26, 4 }
  0x3d   : > { %1411 = vset.pattern.permute.xlu0 %v1542_v10  ;;  %1251 = vmatprep.subr.bf16.mxu0 %v1543_v11  ;;  %v1413_v13 = vld [vmem:[%s1699_s14 + $0x8] sm:$0xff]   ;;  %v1545_v15 = vmov 1966171168   ;;  %v398_v18 = vstv %s1194_s24  ;;  %vm468_vm3 = vcmask 130048   ;;  %v1414_v33 = vld [vmem:[%s1699_s14 + $0x10] sm:$0xff]   ;;  %v1415_v36 = vld [vmem:[%s1699_s14 + $0x18] sm:$0xff]  }
  0x3e   : > { %402 = vperm.xlu0 %1411, %v400_v9   ;;  %1257 = vmatprep.subr.bf16.mxu1 %v1543_v11  ;;  %v410_v16 = vunpack.c.l.s4 %v1545_v15  ;;  %v396_v17 = vand.u32 127, %v395_v14  ;;  %v413_v21 = vshrl.u32 %v395_v14, 7  ;;  %v1416_v42 = vld [vmem:[%s1699_s14 + $0x20] sm:$0xff]   ;;  %v1417_v44 = vld [vmem:[%s1699_s14 + $0x28] sm:$0xff]   ;;  %v1418_v50 = vld [vmem:[%s1699_s14 + $0x30] sm:$0xff]   ;;  %vm900_vm4 = vcmask 1041409  }
  0x3f   : > { %1252 = vmatpush3.bf16.msra.mxu0 %v1412_v12  ;;  %1258 = vmatpush3.bf16.msra.mxu1 %v1413_v13  ;;  %v1419_v52 = vld [vmem:[%s1699_s14 + $0x38] sm:$0xff]   ;;  %vm903_vm5 = vcmask 1042434   ;;  %vm906_vm6 = vcmask 1043459   ;;  %vm909_vm7 = vcmask 1044484   ;;  %vm912_vm8 = vcmask 1045509   ;;  %p1216_p5 = scmp.ne.s32.totalorder %s1523_s26, 2 }
  0x40   : > { %1263 = vmatprep.subr.bf16.mxu0 %v1543_v11  ;;  %1253 = vmatprep.mubr.msk.bf16.mxu0 %vm1544_vm1, %v1543_v11  ;;  %v411_v19 = vunpack.c.0.s8 %v410_v16  ;;  %v399_v20 = vadd.s32 %v398_v18, %v396_v17  ;;  %v460_v29 = vsub.s32 0, %v413_v21  ;;  %vm915_vm9 = vcmask 1046534  }
  0x41   : > { %1259 = vmatprep.mubr.msk.bf16.mxu1 %vm1544_vm1, %v1543_v11  ;;  %1269 = vmatprep.subr.bf16.mxu1 %v1543_v11  ;;  %vm918_vm10 = vcmask 1047559   ;;  %vm922_vm11 = vcmask 261120   ;;  %vm1548_vm12 = vmmov (!%p1216_p5), 0  }
  0x42   : > { %v414_v23 = vsub.s32 %v411_v19, %v413_v21 }
  0xbd   : > { %v403_v22 = vpop.permute.xlu0 %402 }
  0xbe   : > { %vm404_vm2 = vcmp.lt.s32.totalorder %v399_v20, %v403_v22 }
  0xbf   : > { %v1195_v24 = vsel %vm404_vm2, 1.0, %v1543_v11 }
  0xc0   : > { %v407_v25 = vpack.c.bf16 %v1195_v24, %v1195_v24 }
  0xc2   : > { %v415_v26 = vrot.slane %v407_v25, %v414_v23 }
  0xc4   : > { %v416_v27 = vcombine.high %v415_v26, %v415_v26  ;;  %v423_v28 = vrot.slane %v415_v26, %v414_v23 }
  0xc6   : > { %v1196_v30 = vpack.i.b16 %v423_v28, %v423_v28  ;;  %v434_v31 = vunpack.i.h.s16 %v423_v28  ;;  %v430_v32 = vrot.slane %v416_v27, %v414_v23  ;;  %v431_v40 = vcombine.high %v423_v28, %v423_v28 }
  0xc8   : > { %v461_v34 = vrot.slane %v1196_v30, %v460_v29  ;;  %v512_v35 = vpack.i.b16 %v434_v31, %v434_v31  ;;  %v436_v37 = vunpack.i.h.s16 %v430_v32  ;;  %v1201_v39 = vpack.i.b16 %v430_v32, %v430_v32 }
  0xc9   : > { %v438_v45 = vunpack.i.h.s16 %v431_v40  ;;  %v1206_v47 = vpack.i.b16 %v431_v40, %v431_v40  ;;  %v432_v48 = vcombine.high %v430_v32, %v430_v32 }
  0xca   : > { %1254 = vmatmul.mubr.msk.bf16.vlgmr.msra.gmra.mrb[0].mxu0 %vm468_vm3, %v461_v34  ;;  %v516_v38 = vrot.slane %v512_v35, %v460_v29  ;;  %v620_v41 = vpack.i.b16 %v436_v37, %v436_v37  ;;  %v570_v43 = vrot.slane %v1201_v39, %v460_v29  ;;  %v890_v35 = vld [vmem:[#allocation2] sm:$0xff] }
  0xcb   : > { %1264 = vmatpush3.bf16.msra.mxu0 %v1414_v33  ;;  %1265 = vmatprep.mubr.msk.bf16.mxu0 %vm1544_vm1, %v1543_v11  ;;  %v728_v49 = vpack.i.b16 %v438_v45, %v438_v45  ;;  %v678_v51 = vrot.slane %v1206_v47, %v460_v29  ;;  %v440_v53 = vunpack.i.h.s16 %v432_v48  ;;  %v1211_v55 = vpack.i.b16 %v432_v48, %v432_v48  ;;  %v1421_v47 = vld [vmem:[%s1834_s2] sm:$0xff] (!%p1216_p5)  }
  0xcc   : > { %1260 = vmatmul.mubr.msk.bf16.vlgmr.msra.gmra.mrb[0].mxu1 %vm468_vm3, %v516_v38  ;;  %1275 = vmatprep.subr.bf16.mxu0 %v1543_v11  ;;  %v624_v46 = vrot.slane %v620_v41, %v460_v29  ;;  %v1547_v48 = vmov (!%p1216_p5), 0.0  }
  0xcd   : > { %1270 = vmatpush3.bf16.msra.mxu1 %v1415_v36  ;;  %1271 = vmatprep.mubr.msk.bf16.mxu1 %vm1544_vm1, %v1543_v11  ;;  %v732_v54 = vrot.slane %v728_v49, %v460_v29  ;;  %v836_v56 = vpack.i.b16 %v440_v53, %v440_v53  ;;  %v786_v57 = vrot.slane %v1211_v55, %v460_v29  ;;  %v1422_v49 = vld [vmem:[%s1834_s2 + $0x8] sm:$0xff] (!%p1216_p5)   ;;  %v1423_v55 = vld [vmem:[%s1836_s4] sm:$0xff] (!%p1216_p5)  }
  0xce   : > { %1281 = vmatprep.subr.bf16.mxu1 %v1543_v11 }
  0xcf   : > { %v840_v58 = vrot.slane %v836_v56, %v460_v29  ;;  %v1424_v56 = vld [vmem:[%s1836_s4 + $0x8] sm:$0xff] (!%p1216_p5)  }
  0xd2   : > { %1266 = vmatmul.mubr.msk.bf16.vlgmr.msra.gmra.mrb[4].mxu0 %vm468_vm3, %v570_v43  ;;  %v928_v43 = vld [vmem:[%s1697_s17] sm:$0xff] (!%p1216_p5) }
  0xd3   : > { %1276 = vmatpush3.bf16.msra.mxu0 %v1416_v42  ;;  %1277 = vmatprep.mubr.msk.bf16.mxu0 %vm1544_vm1, %v1543_v11  ;;  %v929_v45 = vcvt.s32.f32 (!%p1216_p5), %v928_v43 }
  0xd4   : > { %1272 = vmatmul.mubr.msk.bf16.vlgmr.msra.gmra.mrb[4].mxu1 %vm468_vm3, %v624_v46  ;;  %1287 = vmatprep.subr.bf16.mxu0 %v1543_v11 }
  0xd5   : > { %1282 = vmatpush3.bf16.msra.mxu1 %v1417_v44  ;;  %1283 = vmatprep.mubr.msk.bf16.mxu1 %vm1544_vm1, %v1543_v11  ;;  %v1546_v44 = vmov (!%p1216_p5), 0   ;;  %v930_v46 = vmax.f32 (!%p1216_p5), %v929_v45, 1.0 }
  0xd6   : > { %1293 = vmatprep.subr.bf16.mxu1 %v1543_v11  ;;  %1420 = vset.pattern.permute.xlu0 (!%p1216_p5), %v1546_v44 }
  0xd7   : > { %934 = vperm.xlu0 (!%p1216_p5), %1420, %v930_v46  }
  0xda   : > { %1278 = vmatmul.mubr.msk.bf16.vlgmr.msra.gmra.mrb[8].mxu0 %vm468_vm3, %v678_v51 }
  0xdb   : > { %1288 = vmatpush3.bf16.msra.mxu0 %v1418_v50  ;;  %1289 = vmatprep.mubr.msk.bf16.mxu0 %vm1544_vm1, %v1543_v11 }
  0xdc   : > { %1284 = vmatmul.mubr.msk.bf16.vlgmr.msra.gmra.mrb[8].mxu1 %vm468_vm3, %v732_v54  ;;  %1299 = vmatprep.subr.bf16.mxu0 (!%p1216_p5), %v1547_v48 }
  0xdd   : > { %1294 = vmatpush3.bf16.msra.mxu1 %v1419_v52  ;;  %1295 = vmatprep.mubr.msk.bf16.mxu1 %vm1544_vm1, %v1543_v11 }
  0xde   : > { %1307 = vmatprep.subr.bf16.mxu1 (!%p1216_p5), %v1547_v48 }
  0xe2   : > { %1290 = vmatmul.mubr.msk.bf16.vlgmr.msra.gmra.mrb[12].mxu0 %vm468_vm3, %v786_v57  ;;  %v1217_v57 = vld [vmem:[%s1835_s3] ss:$0 sm:$0xff] (!%p1216_p5) }
  0xe3   : > { %1303 = vmatprep.mubr.msk.bf16.mxu0 (!%p1216_p5), %vm1548_vm12, %v1547_v48  ;;  %1300 = vmatpush3.bf16.msra.mxu0 (!%p1216_p5), %v1421_v47 }
  0xe4   : > { %1296 = vmatmul.mubr.msk.bf16.vlgmr.msra.gmra.mrb[12].mxu1 %vm468_vm3, %v840_v58  ;;  %1301 = vmatprep.subr.bf16.mxu0 (!%p1216_p5), %v1547_v48 }
  0xe5   : > { %1311 = vmatprep.mubr.msk.bf16.mxu1 (!%p1216_p5), %vm1548_vm12, %v1547_v48  ;;  %1308 = vmatpush3.bf16.msra.mxu1 (!%p1216_p5), %v1423_v55 }
  0xe6   : > { %1309 = vmatprep.subr.bf16.mxu1 (!%p1216_p5), %v1547_v48 }
  0xe7   : > { %1302 = vmatpush3.bf16.msra.mxu0 (!%p1216_p5), %v1422_v49 }
  0xe9   : > { %1310 = vmatpush3.bf16.msra.mxu1 (!%p1216_p5), %v1424_v56 }
 0x156   : > { %v935_v50 = vpop.permute.xlu0 (!%p1216_p5), %934 }
 0x157   : > { %1425 = vrcp.f32 (!%p1216_p5), %v935_v50 }
 0x161   : > { %v1426_v52 = vpop.eup (!%p1216_p5), %1425 }
 0x19d   : > { %v506_v59 = vpop.f32.mrb[0].mxu0 }
 0x19e   : > { %v1255_v60 = vpop.f32.mrb[1].mxu0 }
 0x19f   : > { %v509_v61 = vpop.f32.mrb[2].mxu0  ;;  %v560_v62 = vpop.f32.mrb[0].mxu1 }
 0x1a0   : > { %v899_v63 = vrot.slane %v560_v62, 7  ;;  %v1256_v0 = vpop.f32.mrb[3].mxu0  ;;  %v1261_v1 = vpop.f32.mrb[1].mxu1 }
 0x1a1   : > { %v563_v2 = vpop.f32.mrb[2].mxu1  ;;  %v1221_v1 = vld [vmem:[%s1837_s5] ss:$0 sm:$0xff] (!%p1216_p5) }
 0x1a2   : > { %v901_v3 = vsel %vm900_vm4, %v899_v63, %v506_v59  ;;  %v1262_v4 = vpop.f32.mrb[3].mxu1 }
 0x1a5   : > { %v614_v5 = vpop.f32.mrb[4].mxu0 }
 0x1a6   : > { %v902_v6 = vrot.slane %v614_v5, 6  ;;  %v1267_v7 = vpop.f32.mrb[5].mxu0 }
 0x1a7   : > { %v617_v8 = vpop.f32.mrb[6].mxu0  ;;  %v668_v9 = vpop.f32.mrb[4].mxu1 }
 0x1a8   : > { %v904_v10 = vsel %vm903_vm5, %v902_v6, %v901_v3  ;;  %v905_v11 = vrot.slane %v668_v9, 5  ;;  %v1268_v12 = vpop.f32.mrb[7].mxu0  ;;  %v1273_v13 = vpop.f32.mrb[5].mxu1 }
 0x1a9   : > { %v671_v14 = vpop.f32.mrb[6].mxu1 }
 0x1aa   : > { %v907_v15 = vsel %vm906_vm6, %v905_v11, %v904_v10  ;;  %v1274_v16 = vpop.f32.mrb[7].mxu1 }
 0x1ad   : > { %v722_v17 = vpop.f32.mrb[8].mxu0 }
 0x1ae   : > { %v908_v18 = vrot.slane %v722_v17, 4  ;;  %v1279_v19 = vpop.f32.mrb[9].mxu0 }
 0x1af   : > { %v725_v20 = vpop.f32.mrb[10].mxu0  ;;  %v776_v21 = vpop.f32.mrb[8].mxu1 }
 0x1b0   : > { %v910_v22 = vsel %vm909_vm7, %v908_v18, %v907_v15  ;;  %v911_v23 = vrot.slane %v776_v21, 3  ;;  %v1280_v24 = vpop.f32.mrb[11].mxu0  ;;  %v1285_v25 = vpop.f32.mrb[9].mxu1 }
 0x1b1   : > { %v779_v26 = vpop.f32.mrb[10].mxu1 }
 0x1b2   : > { %v913_v27 = vsel %vm912_vm8, %v911_v23, %v910_v22  ;;  %v1286_v28 = vpop.f32.mrb[11].mxu1 }
 0x1b5   : > { %v830_v29 = vpop.f32.mrb[12].mxu0 }
 0x1b6   : > { %v914_v30 = vrot.slane %v830_v29, 2  ;;  %v1291_v31 = vpop.f32.mrb[13].mxu0 }
 0x1b7   : > { %v833_v32 = vpop.f32.mrb[14].mxu0  ;;  %v884_v33 = vpop.f32.mrb[12].mxu1  ;;  %927 = sbr.rel (%p1216_p5) target bundleno = 899 (0x383), region = 93 }
 0x1b8   : > { %v916_v34 = vsel %vm915_vm9, %v914_v30, %v913_v27  ;;  %v917_v36 = vrot.slane %v884_v33, 1  ;;  %v1292_v37 = vpop.f32.mrb[15].mxu0  ;;  %v1297_v38 = vpop.f32.mrb[13].mxu1 }
 0x1b9   : > { %v887_v39 = vpop.f32.mrb[14].mxu1 }
 0x1ba   : > { %v919_v40 = vsel %vm918_vm10, %v917_v36, %v916_v34  ;;  %v1298_v41 = vpop.f32.mrb[15].mxu1 }
 0x1bb   : > { %v921_v42 = vadd.f32 %v919_v40, %v890_v35 }
 0x1bd   : > { %923 = vst.msk [vmem:[#allocation2] sm:$0xff] %vm922_vm11, %v921_v42 }
 0x1c4   : > { %v931_v51 = vld [vmem:[#allocation2] sm:$0xff] }
 0x1c5   : > { %v938_v53 = vmul.f32 %v1426_v52, %v931_v51 }
 0x1c7   : > { %v939_v54 = vpack.c.bf16 %v938_v53, %v938_v53 }
 0x1c9   : > { %1304 = vmatmul.mubr.msk.bf16.vlgmr.msra.gmra.mrb[0].mxu0 %vm922_vm11, %v939_v54 }
 0x29c   : > { %v1000_v58 = vpop.f32.mrb[0].mxu0 }
 0x29d   : > { %v1001_v59 = vadd.f32 %v1217_v57, %v1000_v58  ;;  %v1305_v60 = vpop.f32.mrb[1].mxu0 }
 0x29e   : > { %v1003_v61 = vpop.f32.mrb[2].mxu0 }
 0x29f   : > { %1427 = vtanh.f32 %v1001_v59  ;;  %v1306_v62 = vpop.f32.mrb[3].mxu0 }
 0x2a9   : > { %v1428_v63 = vpop.eup %1427 }
 0x2aa   : > { %v1007_v0 = vpack.c.bf16 %v1428_v63, %v1428_v63 }
 0x2ac   : > { %1312 = vmatmul.mubr.msk.bf16.vlgmr.msra.gmra.mrb[0].mxu1 %vm922_vm11, %v1007_v0 }
 0x37f   : > { %v1068_v2 = vpop.f32.mrb[0].mxu1 }
 0x380   : > { %v1069_v3 = vadd.f32 %v1221_v1, %v1068_v2  ;;  %v1313_v4 = vpop.f32.mrb[1].mxu1 }
 0x381   : > { %v1071_v5 = vpop.f32.mrb[2].mxu1 }
 0x382   : > { %1074 = vst [vmem:[%s381_s11] sm:$0xff] %v1069_v3  ;;  %v1314_v6 = vpop.f32.mrb[3].mxu1 }
 0x383 PF: > { %s1226_s20 = sshll.u32 %s1527_s27, 7  ;;  %s1089_s16 = sshll.u32 %s381_s11, 4  ;;  %s1090_s16 = int_to_ptr.vmem [resolvable:$true] %s1089_s16 }
 0x384   : > { %s1775_s12 = scalar_lea.hbm %s1838_s6, %s1226_s20  ;;  %s1076_s17 = scalar_lea.sflag [#allocation5], %s379_s10 }
 0x385   : > { %s1429_s14 = scalar_lea.vmem %s1090_s16, 128  ;;  %s1549_s24 = smov [#allocation4]  }
 0x386   : > { %p1430_p6 = scmp.ne.s32.totalorder %s1090_s16, %s1429_s14  ;;  %s1433_s9 = sshll.u32 %s1549_s24, 4  ;;  %s1434_s9 = int_to_ptr.vmem [resolvable:$false] %s1433_s9 }
 0x387   : > { %s1435_s13 = scalar_lea.vmem %s1434_s9, 256  ;;  %p1436_p10 = scmp.lt.s32.totalorder %s1090_s16, %s1434_s9 }
 0x388   : > { %p1431_p8 = pnand %p1430_p6, %p1657_p7  ;;  %p1437_p11 = scmp.lt.s32.totalorder %s1435_s13, %s1429_s14 }
 0x38a   : > { %p1432_p9 = pneg %p1431_p8  ;;  %p1438_p13 = por %p1437_p11, %p1436_p10 }
 0x38c   : > { %p1439_p0 = pnand %p1438_p13, %p1432_p9 }
 0x38e   : > { %1442 = shalt.err (!%p1439_p0)
}
 0x38f   : > { %s1443_s27 = scalar_lea.hbm %s1775_s12, 128  ;;  %s1447_s11 = scalar_lea.hbm %s1838_s6, 256 }
 0x390   : > { %p1444_p1 = scmp.ne.s32.totalorder %s1775_s12, %s1443_s27  ;;  %p1448_p4 = scmp.lt.u32.totalorder %s1775_s12, %s1838_s6 }
 0x391   : > { %p1449_p5 = scmp.lt.u32.totalorder %s1447_s11, %s1443_s27  ;;  %p1451_p8 = scmp.lt.u32.totalorder %s1443_s27, %s1775_s12 }
 0x392   : > { %p1445_p2 = pnand %p1444_p1, %p1657_p7 }
 0x393   : > { %p1450_p6 = por %p1449_p5, %p1448_p4 }
 0x394   : > { %p1446_p3 = pneg %p1445_p2 }
 0x395   : > { %p1452_p9 = por %p1451_p8, %p1450_p6 }
 0x397   : > { %p1453_p10 = pnand %p1452_p9, %p1446_p3 }
 0x399   : > { %1456 = shalt.err (!%p1453_p10)
}
 0x39a   : > { %1316 = dma.vmem_to_hbm [thread:$0]  (%p1657_p7), %s1090_s16, 128, %s1775_s12, %s1076_s17  }
 0x39b PF: > { %p1322_p11 = scmp.ge.s32.totalorder %s1539_s30, 2  ;;  %s1101_s26 = sand.u32 1, %s1503_s21  }
 0x39c   : > { %s1102_s14 = scalar_lea.sflag [#allocation5], %s1101_s26 }
 0x39d   : > { %p1319_p13 = pnand %p1322_p11, %p1665_p12 }
 0x39f   : > { %1498 = dma.done.wait (!%p1319_p13), %s1102_s14, 128  }
 0x3a0   : > { %1500 = vsyncadd (!%p1319_p13), %s1102_s14, 4294967168  ;;  %s19_s30 = sadd.s32 1, %s1539_s30   ;;  %s1847_s15 = sld [smem:[#allocation9_spill]] }
 0x3a1   : > { %p16_p0 = scmp.ge.s32.totalorder %s19_s30, 8   ;;  %s1848_s12 = sld [smem:[#allocation7_spill]] }
 0x3a2   : > { %s1849_s16 = sld [smem:[#allocation8_spill]]  ;;  %s1850_s21 = smov %s1507_s22 }
 0x3a3   : > { %s1851_s22 = smov %s1511_s23  ;;  %s1852_s23 = smov %s1670_s19 }
 0x3a4   : > { %s1853_s24 = smov %s1519_s25  ;;  %s1855_s26 = smov %s1531_s28 }
 0x3a5   : > { %s1856_s27 = smov %s1535_s29  ;;  %18 = sbr.rel (!%p16_p0) target bundleno = 6 (0x6), region = 136 }
 0x3a6   : > { %s1854_s25 = smov %s1847_s15 }
 0x3a7   : > { %s1857_s28 = smov %s1848_s12 }
 0x3a8   : > { %s1858_s29 = smov %s1849_s16 }
 0x3ac   :  { %1107 = vsyncpa [#allocation5], 1 }
 0x3ad   :  { %1109 = vsyncpa [#allocation5 + $0x1], 1 }

</bundles_post_ra>
